<compile_context>
chip_gen: v6e
topology: v6e:2x2x1
jax: 0.10.0
libtpu: 0.0.40
codegen_flags: <defaults>
</compile_context>

<pallas_src>
import functools

import jax
import jax.numpy as jnp
from jax.experimental import pallas as pl
from jax.experimental.pallas import tpu as pltpu


def _ann_fused_kernel(*refs, n_layers, carry_dtype):
    """Fused forward over all layers: activations never leave VMEM/vregs.

    refs layout:
      refs[0]                          : x        (TB, in_features_0)
      refs[1 + 2*i], refs[2 + 2*i]     : layer i  (w_eff (in, out), b_eff (1, out))
      refs[-1]                         : output   (TB, out_features_last)
    """
    x_ref = refs[0]
    layer_refs = refs[1:1 + 2 * n_layers]
    o_ref = refs[1 + 2 * n_layers]

    x = x_ref[...].astype(carry_dtype)
    for i in range(n_layers):
        w_ref = layer_refs[2 * i]        # (in, out) effective weight (MXU dtype)
        b_ref = layer_refs[2 * i + 1]    # (1, out)  effective bias (f32)

        # Canonical (M,K) x (K,N) MXU contraction, f32 accumulation.
        y = jnp.dot(x, w_ref[...], preferred_element_type=jnp.float32)
        y = y + b_ref[...]               # bias add in f32 (broadcast over rows)

        if i < n_layers - 1:
            # Tanh only BETWEEN linears (matches the Sequential).  Elementwise
            # math stays f32 (v5e VPU/EUP have no bf16); cast once for carry.
            x = jnp.tanh(y).astype(carry_dtype)
        else:
            x = y

    # TODO(synk): out_features_last < 128 lanes -> masked vst; if output
    # writeback ever shows in the profile, present a lane-dense output slab.
    o_ref[...] = x.astype(o_ref.dtype)


def prepare_ann_params(params):
    """One-time layout prep (NOT per forward).

    params: list of (w, b, rate, maxgain) with PyTorch layouts:
        w: (out, in), b: (out,), rate/maxgain: (out, in + 1)
    returns: list of (w_T, b, rate_w_T, rate_b, mg_w_T, mg_b) with the weight-
    shaped arrays pre-transposed to (in, out) so the in-kernel matmul is the
    clean MXU (M,K)x(K,N) form, and biases reshaped to (1, out).
    """
    prepped = []
    for (w, b, rate, maxgain) in params:
        w = jnp.asarray(w)
        out_f = w.shape[0]
        prepped.append((
            w.T,                                             # (in, out)
            jnp.asarray(b).reshape(1, out_f),                # (1, out)
            jnp.asarray(rate)[:, 1:].T,                      # (in, out)
            jnp.asarray(rate)[:, 0].reshape(1, out_f),       # (1, out)
            jnp.asarray(maxgain)[:, 1:].T,                   # (in, out)
            jnp.asarray(maxgain)[:, 0].reshape(1, out_f),    # (1, out)
        ))
    return prepped


def _pick_batch_tile(B):
    """Batch tile: full batch when tiny; otherwise big tiles (amortize the
    ~0.35us per-grid-step overhead) while keeping >= 2 tiles so both v7x
    TensorCores get work under dimension_semantics=('parallel',)."""
    if B <= 8:
        return B
    if B <= 2048:
        half = -(-((B + 1) // 2) // 8) * 8   # ceil(B/2) rounded up to f32 sublane
        return half if half < B else B
    return 1024


def ann_model_forward(x, prepped_params, *, use_bf16_mxu=True):
    """Single fused pallas_call over the whole network.

    x: (B, in_features_0) float32
    prepped_params: output of prepare_ann_params().
    use_bf16_mxu: bf16 MXU operands + bf16 activation carry (f32 accumulation,
                  f32 elementwise).  Set False for an exact-f32 path.
    """
    n_layers = len(prepped_params)
    B, in0 = x.shape
    out_last = prepped_params[-1][0].shape[1]

    mxu_dtype = jnp.bfloat16 if use_bf16_mxu else jnp.float32
    carry_dtype = mxu_dtype

    # Voltage transform hoisted OUT of the Pallas grid: computed once per
    # forward as tiny fused XLA elementwise ops, so the kernel only consumes
    # the effective (already-transposed) weights and biases.
    eff = []
    for (w_t, b2, rw_t, rb, mw_t, mb) in prepped_params:
        w_eff = (mw_t * jnp.tanh(rw_t * w_t)).astype(mxu_dtype)   # (in, out)
        b_eff = (mb * jnp.tanh(rb * b2)).astype(jnp.float32)      # (1, out)
        eff.append((w_eff, b_eff))

    TB = _pick_batch_tile(B)
    nb = pl.cdiv(B, TB)

    in_specs = [pl.BlockSpec((TB, in0), lambda i: (i, 0))]        # x: batch-blocked
    flat_args = [x]

    flops = 0
    transcendentals = 0
    bytes_accessed = x.size * x.dtype.itemsize + B * out_last * x.dtype.itemsize
    for li, (w_eff, b_eff) in enumerate(eff):
        in_f, out_f = w_eff.shape
        flops += 2 * B * in_f * out_f
        if li < n_layers - 1:
            transcendentals += B * out_f                          # activation tanh
        bytes_accessed += w_eff.size * w_eff.dtype.itemsize
        bytes_accessed += b_eff.size * b_eff.dtype.itemsize
        # Full-array blocks with a constant index_map: each effective weight is
        # DMA'd once and stays VMEM-resident across the (sequential or
        # core-sharded) batch grid.
        # TODO(synk): mark these pipeline_mode=pl.Buffered(1) if the spare
        # double-buffer copy ever matters for VMEM headroom on v7x (64 MiB).
        in_specs.append(pl.BlockSpec(w_eff.shape, lambda i: (0, 0)))
        in_specs.append(pl.BlockSpec(b_eff.shape, lambda i: (0, 0)))
        flat_args.append(w_eff)
        flat_args.append(b_eff)

    kernel = functools.partial(_ann_fused_kernel,
                               n_layers=n_layers,
                               carry_dtype=carry_dtype)

    return pl.pallas_call(
        kernel,
        out_shape=jax.ShapeDtypeStruct((B, out_last), x.dtype),
        grid=(nb,),
        in_specs=in_specs,
        out_specs=pl.BlockSpec((TB, out_last), lambda i: (i, 0)),
        compiler_params=pltpu.CompilerParams(
            dimension_semantics=("parallel",),   # batch tiles independent (v7x megacore)
            vmem_limit_bytes=32 * 1024 * 1024,   # safe scoped limit on v5e/v6e/v7x
        ),
        cost_estimate=pl.CostEstimate(
            flops=flops,
            transcendentals=transcendentals,
            bytes_accessed=bytes_accessed,
        ),
    )(*flat_args)


def init_ann_params(key, networkshape):
    """networkshape: list of (out_features, in_features), like the PyTorch module."""
    params = []
    for (out_f, in_f) in networkshape:
        key, kw, kb = jax.random.split(key, 3)
        bound = 1.0 / jnp.sqrt(jnp.float32(in_f))     # nn.Linear-style uniform init
        w = jax.random.uniform(kw, (out_f, in_f), jnp.float32, -bound, bound)
        b = jax.random.uniform(kb, (out_f,), jnp.float32, -bound, bound)
        rate = 2.0 * jnp.ones((out_f, in_f + 1), jnp.float32)
        maxgain = 1.0 * jnp.ones((out_f, in_f + 1), jnp.float32)
        params.append((w, b, rate, maxgain))
    return params


def _reference_forward(x, params):
    n_layers = len(params)
    for i, (w, b, rate, maxgain) in enumerate(params):
        w_eff = maxgain[:, 1:] * jnp.tanh(rate[:, 1:] * w)
        b_eff = maxgain[:, 0] * jnp.tanh(rate[:, 0] * b)
        x = x @ w_eff.T + b_eff
        if i < n_layers - 1:
            x = jnp.tanh(x)
    return x


if __name__ == "__main__":
    key = jax.random.PRNGKey(0)
    key, kx = jax.random.split(key)

    # networkshape entries are (out_features, in_features) as in ANN_Model.
    networkshape = [(32, 16), (32, 32), (8, 32)]
    batch = 8

    x = jax.random.normal(kx, (batch, networkshape[0][1]), jnp.float32)
    params = init_ann_params(key, networkshape)
    prepped = prepare_ann_params(params)          # one-time layout transpose

    ref = _reference_forward(x, params)

    # Exact-precision path (f32 MXU operands) -> tight tolerance.
    fwd_f32 = jax.jit(functools.partial(ann_model_forward, use_bf16_mxu=False))
    out_f32 = jax.block_until_ready(fwd_f32(x, prepped))
    assert out_f32.shape == (batch, networkshape[-1][0])
    assert jnp.allclose(out_f32, ref, atol=1e-5, rtol=1e-5)

    # Default fast path (bf16 MXU operands / bf16 carry, f32 accumulation)
    # -> looser tolerance (expected bf16 precision difference).
    fwd_bf16 = jax.jit(ann_model_forward)
    out_bf16 = jax.block_until_ready(fwd_bf16(x, prepped))
    assert out_bf16.shape == (batch, networkshape[-1][0])
    assert jnp.allclose(out_bf16, ref, atol=5e-2, rtol=5e-2)

    print("KERNEL_OK")
</pallas_src>

<mosaic_0001>
module attributes {stable_mosaic.version = 11 : i64} {
  func.func @_ann_fused_kernel(%arg0: i32, %arg1: memref<8x16xf32, #tpu.memory_space<vmem>>, %arg2: memref<16x32xf32, #tpu.memory_space<vmem>>, %arg3: memref<1x32xf32, #tpu.memory_space<vmem>>, %arg4: memref<32x32xf32, #tpu.memory_space<vmem>>, %arg5: memref<1x32xf32, #tpu.memory_space<vmem>>, %arg6: memref<32x8xf32, #tpu.memory_space<vmem>>, %arg7: memref<1x8xf32, #tpu.memory_space<vmem>>, %arg8: memref<8x8xf32, #tpu.memory_space<vmem>>) attributes {dimension_semantics = [#tpu.dimension_semantics<parallel>], iteration_bounds = array<i64: 1>, scalar_prefetch = 0 : i64, scratch_operands = 0 : i64, tpu.core_type = #tpu.core_type<tc>, window_params = [{transform_indices = @transform_0, window_bounds = array<i64: 8, 16>}, {pipeline_mode = #tpu.pipeline_mode<synchronous>, transform_indices = @transform_1, window_bounds = array<i64: 16, 32>}, {pipeline_mode = #tpu.pipeline_mode<synchronous>, transform_indices = @transform_2, window_bounds = array<i64: 1, 32>}, {pipeline_mode = #tpu.pipeline_mode<synchronous>, transform_indices = @transform_3, window_bounds = array<i64: 32, 32>}, {pipeline_mode = #tpu.pipeline_mode<synchronous>, transform_indices = @transform_4, window_bounds = array<i64: 1, 32>}, {pipeline_mode = #tpu.pipeline_mode<synchronous>, transform_indices = @transform_5, window_bounds = array<i64: 32, 8>}, {pipeline_mode = #tpu.pipeline_mode<synchronous>, transform_indices = @transform_6, window_bounds = array<i64: 1, 8>}, {transform_indices = @transform_7, window_bounds = array<i64: 8, 8>}]} {
    %c0 = arith.constant 0 : index
    %c0_0 = arith.constant 0 : index
    %0 = vector.load %arg1[%c0, %c0_0] : memref<8x16xf32, #tpu.memory_space<vmem>>, vector<8x16xf32>
    %c0_1 = arith.constant 0 : index
    %c0_2 = arith.constant 0 : index
    %1 = vector.load %arg2[%c0_1, %c0_2] : memref<16x32xf32, #tpu.memory_space<vmem>>, vector<16x32xf32>
    %cst = arith.constant dense<0.000000e+00> : vector<8x32xf32>
    %2 = tpu.matmul %0, %1, %cst {dimension_numbers = #tpu.dot_dimension_numbers<[1], [0], [0], [1], [0, 0, 1, 1], [], []>} : vector<8x16xf32>, vector<16x32xf32>, vector<8x32xf32> -> vector<8x32xf32>
    %c0_3 = arith.constant 0 : index
    %c0_4 = arith.constant 0 : index
    %3 = vector.load %arg3[%c0_3, %c0_4] : memref<1x32xf32, #tpu.memory_space<vmem>>, vector<1x32xf32>
    %4 = vector.broadcast %3 : vector<1x32xf32> to vector<8x32xf32>
    %5 = arith.addf %2, %4 : vector<8x32xf32>
    %6 = math.tanh %5 : vector<8x32xf32>
    %c0_5 = arith.constant 0 : index
    %c0_6 = arith.constant 0 : index
    %7 = vector.load %arg4[%c0_5, %c0_6] : memref<32x32xf32, #tpu.memory_space<vmem>>, vector<32x32xf32>
    %cst_7 = arith.constant dense<0.000000e+00> : vector<8x32xf32>
    %8 = tpu.matmul %6, %7, %cst_7 {dimension_numbers = #tpu.dot_dimension_numbers<[1], [0], [0], [1], [0, 0, 1, 1], [], []>} : vector<8x32xf32>, vector<32x32xf32>, vector<8x32xf32> -> vector<8x32xf32>
    %c0_8 = arith.constant 0 : index
    %c0_9 = arith.constant 0 : index
    %9 = vector.load %arg5[%c0_8, %c0_9] : memref<1x32xf32, #tpu.memory_space<vmem>>, vector<1x32xf32>
    %10 = vector.broadcast %9 : vector<1x32xf32> to vector<8x32xf32>
    %11 = arith.addf %8, %10 : vector<8x32xf32>
    %12 = math.tanh %11 : vector<8x32xf32>
    %c0_10 = arith.constant 0 : index
    %c0_11 = arith.constant 0 : index
    %13 = vector.load %arg6[%c0_10, %c0_11] : memref<32x8xf32, #tpu.memory_space<vmem>>, vector<32x8xf32>
    %cst_12 = arith.constant dense<0.000000e+00> : vector<8x8xf32>
    %14 = tpu.matmul %12, %13, %cst_12 {dimension_numbers = #tpu.dot_dimension_numbers<[1], [0], [0], [1], [0, 0, 1, 1], [], []>} : vector<8x32xf32>, vector<32x8xf32>, vector<8x8xf32> -> vector<8x8xf32>
    %c0_13 = arith.constant 0 : index
    %c0_14 = arith.constant 0 : index
    %15 = vector.load %arg7[%c0_13, %c0_14] : memref<1x8xf32, #tpu.memory_space<vmem>>, vector<1x8xf32>
    %16 = vector.broadcast %15 : vector<1x8xf32> to vector<8x8xf32>
    %17 = arith.addf %14, %16 : vector<8x8xf32>
    %c0_15 = arith.constant 0 : index
    %c0_16 = arith.constant 0 : index
    %18 = vector.load %arg8[%c0_15, %c0_16] : memref<8x8xf32, #tpu.memory_space<vmem>>, vector<8x8xf32>
    tpu.vector_store %arg8[%c0_15, %c0_16], %17 {strides = array<i32>} : memref<8x8xf32, #tpu.memory_space<vmem>>, vector<8x8xf32>,
    return
  }
  func.func @transform_0(%arg0: i32) -> (i32, i32) {
    %c0_i32 = arith.constant 0 : i32
    %c0_i32_0 = arith.constant 0 : i32
    return %arg0, %c0_i32 : i32, i32
  }
  func.func @transform_1(%arg0: i32) -> (i32, i32) {
    %c0_i32 = arith.constant 0 : i32
    %c0_i32_0 = arith.constant 0 : i32
    %c0_i32_1 = arith.constant 0 : i32
    return %c0_i32, %c0_i32_0 : i32, i32
  }
  func.func @transform_2(%arg0: i32) -> (i32, i32) {
    %c0_i32 = arith.constant 0 : i32
    %c0_i32_0 = arith.constant 0 : i32
    %c0_i32_1 = arith.constant 0 : i32
    return %c0_i32, %c0_i32_0 : i32, i32
  }
  func.func @transform_3(%arg0: i32) -> (i32, i32) {
    %c0_i32 = arith.constant 0 : i32
    %c0_i32_0 = arith.constant 0 : i32
    %c0_i32_1 = arith.constant 0 : i32
    return %c0_i32, %c0_i32_0 : i32, i32
  }
  func.func @transform_4(%arg0: i32) -> (i32, i32) {
    %c0_i32 = arith.constant 0 : i32
    %c0_i32_0 = arith.constant 0 : i32
    %c0_i32_1 = arith.constant 0 : i32
    return %c0_i32, %c0_i32_0 : i32, i32
  }
  func.func @transform_5(%arg0: i32) -> (i32, i32) {
    %c0_i32 = arith.constant 0 : i32
    %c0_i32_0 = arith.constant 0 : i32
    %c0_i32_1 = arith.constant 0 : i32
    return %c0_i32, %c0_i32_0 : i32, i32
  }
  func.func @transform_6(%arg0: i32) -> (i32, i32) {
    %c0_i32 = arith.constant 0 : i32
    %c0_i32_0 = arith.constant 0 : i32
    %c0_i32_1 = arith.constant 0 : i32
    return %c0_i32, %c0_i32_0 : i32, i32
  }
  func.func @transform_7(%arg0: i32) -> (i32, i32) {
    %c0_i32 = arith.constant 0 : i32
    %c0_i32_0 = arith.constant 0 : i32
    return %arg0, %c0_i32 : i32, i32
  }
}

</mosaic_0001>

<bundles_post_ra>
// kernel: mul.20
= control target key start
LH: loop header
LB: loop body
LE: loop exit
PB: predicated region body
PF: predicated region fallthrough
CT: control target
= control target key end

     0   :  { %s34_s0 = inlined_call_operand.vmem [shape: f32[32,8], index: 0, kind: input, shape index: {}]   ;;  %s35_s1 = inlined_call_operand.vmem [shape: f32[32,8], index: 1, kind: input, shape index: {}]   ;;  %s36_s2 = inlined_call_operand.vmem [shape: f32[32,8], index: 2, kind: output, shape index: {}]  }
   0x1   :  { %v3_v0 = vld [vmem:[%s34_s0] sm:$0xff] }
   0x2   :  { %v4_v1 = vld [vmem:[%s35_s1] sm:$0xff] }
   0x3   :  { %v7_v2 = vmul.f32 %v4_v1, %v3_v0 }
   0x5   :  { %9 = vst [vmem:[%s36_s2] sm:$0xff] %v7_v2 }

// kernel: ann_model_forward.1
= control target key start
LH: loop header
LB: loop body
LE: loop exit
PB: predicated region body
PF: predicated region fallthrough
CT: control target
= control target key end

     0   :  { %v375_v1 = vmov 0.0   ;;  %vm376_vm0 = vmmov 0   ;;  %s465_s0 = inlined_call_operand.vmem [shape: f32[8,16], index: 0, kind: input, shape index: {}]   ;;  %s466_s1 = inlined_call_operand.vmem [shape: f32[16,32], index: 1, kind: input, shape index: {}]   ;;  %s467_s2 = inlined_call_operand.vmem [shape: f32[1,32], index: 2, kind: input, shape index: {}]   ;;  %s468_s3 = inlined_call_operand.vmem [shape: f32[32,32], index: 3, kind: input, shape index: {}]   ;;  %s469_s4 = inlined_call_operand.vmem [shape: f32[1,32], index: 4, kind: input, shape index: {}]   ;;  %s470_s5 = inlined_call_operand.vmem [shape: f32[32,8], index: 5, kind: input, shape index: {}]   ;;  %s471_s6 = inlined_call_operand.vmem [shape: f32[1,8], index: 6, kind: input, shape index: {}]   ;;  %s472_s7 = inlined_call_operand.hbm [shape: f32[8,8], index: 7, kind: output, shape index: {}]  }
   0x1   :  { %v29_v0 = vld [vmem:[%s466_s1 + $0x8] sm:$0xff]  ;;  %317 = vmatprep.subr.mxu0 %v375_v1  ;;  %v28_v2 = vld [vmem:[%s466_s1] sm:$0xff]  ;;  %321 = vmatprep.mubr.msk.f32.mxu0 %vm376_vm0, %v375_v1 }
   0x2   :  { %12 = vsyncpa [#allocation3], 0  ;;  %318 = vmatpush3.msra.mxu0 %v29_v0  ;;  %v27_v3 = vld [vmem:[%s465_s0] sm:$0xff]  ;;  %vm37_vm1 = vcmask 130048   ;;  %324 = vmatprep.subr.mxu1 %v375_v1  ;;  %v115_v4 = vld [vmem:[%s468_s3 + $0x18] sm:$0xff]  ;;  %vm123_vm2 = vcmask 261120  }
   0x3   :  { %319 = vmatprep.subr.mxu0 %v375_v1  ;;  %332 = vmatprep.mubr.msk.f32.mxu1 %vm376_vm0, %v375_v1  ;;  %v114_v5 = vld [vmem:[%s468_s3 + $0x10] sm:$0xff]  ;;  %v113_v6 = vld [vmem:[%s468_s3 + $0x8] sm:$0xff]  ;;  %v112_v7 = vld [vmem:[%s468_s3] sm:$0xff]  ;;  %s377_s25 = smov [#allocation2]   ;;  %vm282_vm3 = vcmask 64512  }
   0x4   :  { %320 = vmatpush3.msra.mxu0 %v28_v2  ;;  %325 = vmatpush3.msra.mxu1 %v115_v4  ;;  %v298_v8 = vld [vmem:[%s467_s2] ss:$0 sm:$0xff]  ;;  %v201_v13 = vld [vmem:[%s470_s5 + $0x18] sm:$0xff]  ;;  %v200_v14 = vld [vmem:[%s470_s5 + $0x10] sm:$0xff] }
   0x5   :  { %322 = vmatmul.mubr.msk.f32.vlgmr.msra.gmra.mxu0 %vm37_vm1, %v27_v3  ;;  %335 = vmatprep.subr.mxu0 %v375_v1  ;;  %v199_v15 = vld [vmem:[%s470_s5 + $0x8] sm:$0xff]  ;;  %v198_v16 = vld [vmem:[%s470_s5] sm:$0xff]  ;;  %s290_s5 = sshll.u32 %s377_s25, 4  ;;  %s291_s5 = int_to_ptr.vmem [resolvable:$true] %s290_s5 }
   0x6   :  { %343 = vmatprep.mubr.msk.f32.mxu0 %vm376_vm0, %v375_v1  ;;  %326 = vmatprep.subr.mxu1 %v375_v1  ;;  %v300_v17 = vld [vmem:[%s469_s4] ss:$0 sm:$0xff]  ;;  %s353_s4 = scalar_lea.vmem %s291_s5, 128  ;;  %p358_p1 = scmp.lt.s32.totalorder %s291_s5, %s291_s5 }
   0x7   :  { %327 = vmatpush3.msra.mxu1 %v114_v5  ;;  %336 = vmatpush3.msra.mxu0 %v201_v13  ;;  %v302_v22 = vld [vmem:[%s471_s6] ss:$0 sm:$0xff]  ;;  %p354_p0 = scmp.ne.s32.totalorder %s291_s5, %s353_s4  ;;  %p359_p2 = scmp.lt.s32.totalorder %s353_s4, %s353_s4 }
   0x8   :  { %328 = vmatprep.subr.mxu1 %v375_v1  ;;  %337 = vmatprep.subr.mxu0 %v375_v1 }
   0x9   :  { %329 = vmatpush3.msra.mxu1 %v113_v6  ;;  %338 = vmatpush3.msra.mxu0 %v200_v14  ;;  %p360_p3 = por %p359_p2, %p358_p1 }
   0xa   :  { %330 = vmatprep.subr.mxu1 %v375_v1  ;;  %339 = vmatprep.subr.mxu0 %v375_v1 }
   0xb   :  { %331 = vmatpush3.msra.mxu1 %v112_v7  ;;  %340 = vmatpush3.msra.mxu0 %v199_v15  ;;  %p361_p4 = pnand %p360_p3, %p354_p0 }
   0xc   :  { %341 = vmatprep.subr.mxu0 %v375_v1 }
   0xd   :  { %342 = vmatpush3.msra.mxu0 %v198_v16 }
  0xc5   :  { %v107_v9 = vpop.f32.mrf.mxu0 }
  0xc6   :  { %v108_v10 = vadd.f32 %v298_v8, %v107_v9 }
  0xc7   :  { %v323_v11 = vpop.f32.mrf.mxu0 }
  0xc8   :  { %349 = vtanh.f32 %v108_v10 }
  0xd5   :  { %v350_v12 = vpop.eup %349 }
  0xd6   :  { %333 = vmatmul.mubr.msk.f32.vlgmr.msra.gmra.mxu1 %vm123_vm2, %v350_v12 }
 0x196   :  { %v193_v18 = vpop.f32.mrf.mxu1 }
 0x197   :  { %v194_v19 = vadd.f32 %v300_v17, %v193_v18 }
 0x198   :  { %v334_v20 = vpop.f32.mrf.mxu1 }
 0x199   :  { %351 = vtanh.f32 %v194_v19 }
 0x1a6   :  { %v352_v21 = vpop.eup %351 }
 0x1a7   :  { %344 = vmatmul.mubr.msk.f32.vlgmr.msra.gmra.mxu0 %vm123_vm2, %v352_v21 }
 0x267   :  { %v278_v23 = vpop.f32.mrf.mxu0 }
 0x268   :  { %v279_v24 = vadd.f32 %v302_v22, %v278_v23 }
 0x269   :  { %v345_v25 = vpop.f32.mrf.mxu0 }
 0x26a   :  { %283 = vst.msk [vmem:[#allocation2] sm:$0xff] %vm282_vm3, %v279_v24 }
 0x26b   :  { %364 = shalt.err (!%p361_p4)
}
 0x26c   :  { %293 = dma.vmem_to_hbm [thread:$0]  %s291_s5, 128, %s472_s7, [#allocation3]  }
 0x26d   :  { %373 = dma.done.wait [#allocation3], 128  }
 0x26e   :  { %374 = vsyncadd [#allocation3], 4294967168 }
 0x26f   :  { %297 = vsyncpa [#allocation3], 1 }

</bundles_post_ra>
